<compile_context>
chip_gen: v7x
topology: tpu7x:2x2x1
jax: 0.10.0
libtpu: 0.0.40
codegen_flags: <defaults>
</compile_context>

<pallas_src>
import jax
import jax.numpy as jnp
import numpy as np
from jax.experimental import pallas as pl
from jax.experimental.pallas import tpu as pltpu  # noqa: F401  (kept for TPU-specific tuning hooks)

# ---------------- static config (the `args` of NaiveNet) ----------------
NUM_JOINTS = 4
IN_FEATURES = 2
CHANNELS = 32
KERNEL = 3
INFLATION = 2
N_BLOCKS = 2
DROPOUT = 0.25          # unused at inference
BATCH = 2
BN_EPS = 1e-5

JF = NUM_JOINTS * IN_FEATURES                                   # 8
DILATIONS = [INFLATION ** (k + 1) for k in range(N_BLOCKS)]     # 2, 4
SHIFT = [(KERNEL - 1) * d for d in DILATIONS]                   # 4, 8
N_FRAMES = sum(SHIFT) + 3                                       # 15
OUT3 = NUM_JOINTS * 3                                           # 12

SLAB_W = 128                    # lane width of the packed weight slab / output
BC = BATCH * CHANNELS           # 64 lane-batched channel width
HEAD_STRIDE = 2 * CHANNELS      # per-sample output lane stride in the fused head
T_OUT0 = N_FRAMES - (KERNEL - 1)        # 13 rows after the expand conv
IN_ROWS = ((T_OUT0 + 1 + 7) // 8) * 8   # 16 (im2col rows + 1 row for y)
IN_COLS = 64
Y_ROW = T_OUT0                          # row 13 of the merged input holds y

# bias row indices inside the shared bias section
BIAS_EXPAND = 0
BIAS_LIN_A = 1 + 2 * N_BLOCKS           # 5
BIAS_LIN_B = BIAS_LIN_A + 1             # 6
BIAS_HEAD = BIAS_LIN_B + 1              # 7
N_BIAS_ROWS = ((BIAS_HEAD + 1 + 7) // 8) * 8   # 8

assert BATCH * HEAD_STRIDE <= SLAB_W
assert 1 + 2 * OUT3 <= HEAD_STRIDE
assert KERNEL * BATCH * JF <= IN_COLS


# -------------------------- static slab layout ---------------------------
def _layout():
    offs, cur = {}, 0

    def add(name, rows, cols):
        nonlocal cur
        offs[name] = (cur, rows, cols)
        cur += ((rows + 7) // 8) * 8        # keep every section 8-row aligned

    add("expand", KERNEL * BATCH * JF, BC)                  # 48 x 64
    for k in range(N_BLOCKS):
        add(f"dilate{k}", KERNEL * BC, BC)                  # 192 x 64
        add(f"smooth{k}", BC, BC)                           # 64 x 64
    add("lin_a", BATCH * (CHANNELS + JF), BC)               # 80 x 64
    add("lin_b", BC, BC)                                    # 64 x 64
    add("head", 2 * BC, SLAB_W)                             # 128 x 128
    add("bias", N_BIAS_ROWS, SLAB_W)                        # 8 x 128
    return offs, cur


OFFS, SLAB_ROWS = _layout()                                 # 840 rows total


# ----------------------- weight slab construction ------------------------
def pack_params(p):
    """Fold BN scales into the weights and pack everything into one
    (SLAB_ROWS, 128) f32 slab with batch-block-diagonal weight sections.
    Call ONCE at model init (hoisted out of the forward pass)."""

    def bdiag(m):
        r, c = m.shape
        out = jnp.zeros((BATCH * r, BATCH * c), jnp.float32)
        for b in range(BATCH):
            out = out.at[b * r:(b + 1) * r, b * c:(b + 1) * c].set(m)
        return out

    def tile_b(v):
        return jnp.concatenate([jnp.asarray(v, jnp.float32)] * BATCH)

    sec = {}

    # expand conv (dilation 1), BN scale folded: rows = [tap][sample][feature]
    ew = p["expand_w"] * p["expand_s"][:, None, None]               # (C, JF, K)
    sec["expand"] = jnp.concatenate(
        [bdiag(ew[:, :, t].T) for t in range(KERNEL)], axis=0)

    for k in range(N_BLOCKS):
        dw = p["dilate_w"][k] * p["dilate_s"][k][:, None, None]     # (C, C, K)
        sec[f"dilate{k}"] = jnp.concatenate(
            [bdiag(dw[:, :, t].T) for t in range(KERNEL)], axis=0)
        sw = p["smooth_w"][k][:, :, 0] * p["smooth_s"][k][:, None]  # (C, C)
        sec[f"smooth{k}"] = bdiag(sw.T)

    law = p["lin_a_w"]                                              # (C, C+JF)
    sec["lin_a"] = jnp.concatenate(
        [bdiag(law[:, :CHANNELS].T), bdiag(law[:, CHANNELS:].T)], axis=0)
    sec["lin_b"] = bdiag(p["lin_b_w"].T)

    # fused head: rows 0:2C act on lin_b output, rows 2C:4C act on feat;
    # per-sample outputs live at lane offset b*HEAD_STRIDE.
    hw = jnp.zeros((2 * BC, SLAB_W), jnp.float32)
    for b in range(BATCH):
        c0 = b * HEAD_STRIDE
        hw = hw.at[b * CHANNELS:(b + 1) * CHANNELS, c0:c0 + 1].set(p["accept_w"].T)
        hw = hw.at[b * CHANNELS:(b + 1) * CHANNELS, c0 + 1:c0 + 1 + OUT3].set(p["refine_w"].T)
        hw = hw.at[BC + b * CHANNELS:BC + (b + 1) * CHANNELS,
                   c0 + 1 + OUT3:c0 + 1 + 2 * OUT3].set(p["agnost_w"].T)
    sec["head"] = hw

    # all biases share ONE 8-row section
    brows = jnp.zeros((N_BIAS_ROWS, SLAB_W), jnp.float32)
    brows = brows.at[BIAS_EXPAND, :BC].set(tile_b(p["expand_b"]))
    for k in range(N_BLOCKS):
        brows = brows.at[1 + 2 * k, :BC].set(tile_b(p["dilate_b"][k]))
        brows = brows.at[2 + 2 * k, :BC].set(tile_b(p["smooth_b"][k]))
    brows = brows.at[BIAS_LIN_A, :BC].set(tile_b(p["lin_a_b"]))
    brows = brows.at[BIAS_LIN_B, :BC].set(tile_b(p["lin_b_b"]))
    hb = jnp.zeros((SLAB_W,), jnp.float32)
    for b in range(BATCH):
        c0 = b * HEAD_STRIDE
        hb = hb.at[c0].set(p["accept_b"][0])
        hb = hb.at[c0 + 1:c0 + 1 + OUT3].set(p["refine_b"])
        hb = hb.at[c0 + 1 + OUT3:c0 + 1 + 2 * OUT3].set(p["agnost_b"])
    brows = brows.at[BIAS_HEAD].set(hb)
    sec["bias"] = brows

    slab = jnp.zeros((SLAB_ROWS, SLAB_W), jnp.float32)
    for name, (o, r, c) in OFFS.items():
        slab = slab.at[o:o + r, :c].set(jnp.asarray(sec[name], jnp.float32))
    return slab


# ------------------------------- kernel ----------------------------------
def _kernel(x_ref, w_ref, out_ref):
    def W(name):
        o, r, c = OFFS[name]                     # static Python ints
        return w_ref[o:o + r, :c]

    bo = OFFS["bias"][0]

    def B_(i, c):
        return w_ref[bo + i:bo + i + 1, :c]

    # expand conv (pre-im2col'ed, lane-batched): one matmul for the whole batch
    h = x_ref[0:T_OUT0, 0:KERNEL * BATCH * JF]                          # (13, 48)
    h = jnp.maximum(
        jnp.dot(h, W("expand"), preferred_element_type=jnp.float32)
        + B_(BIAS_EXPAND, BC), 0.0)                                     # (13, 64)

    d = INFLATION
    for k in range(N_BLOCKS):
        sh = (KERNEL - 1) * d
        t_out = h.shape[0] - sh
        res = h[sh:, :]                                                 # residual
        # im2col over time (shared by both samples: batch lives on lanes)
        xcat = jnp.concatenate(
            [h[t * d:t * d + t_out, :] for t in range(KERNEL)], axis=1)  # (t_out, 3*BC)
        h = jnp.maximum(
            jnp.dot(xcat, W(f"dilate{k}"), preferred_element_type=jnp.float32)
            + B_(1 + 2 * k, BC), 0.0)
        h = jnp.maximum(
            jnp.dot(h, W(f"smooth{k}"), preferred_element_type=jnp.float32)
            + B_(2 + 2 * k, BC), 0.0)
        h = h + res
        d *= INFLATION
    # h: (1, BC) = [feat_s0 | feat_s1]

    y = x_ref[Y_ROW:Y_ROW + 1, 0:BATCH * JF]                            # (1, 16)
    a = jnp.concatenate([h, y], axis=1)                                 # (1, 80)
    a = jnp.maximum(
        jnp.dot(a, W("lin_a"), preferred_element_type=jnp.float32)
        + B_(BIAS_LIN_A, BC), 0.0)
    a = jnp.maximum(
        jnp.dot(a, W("lin_b"), preferred_element_type=jnp.float32)
        + B_(BIAS_LIN_B, BC), 0.0)

    # single fused head matmul + one full (8, 128) unmasked store
    head_in = jnp.concatenate([a, h], axis=1)                           # (1, 128)
    out = jnp.dot(head_in, W("head"), preferred_element_type=jnp.float32) \
        + B_(BIAS_HEAD, SLAB_W)
    out_ref[...] = jnp.broadcast_to(out, (8, SLAB_W))


# ------------------------------ wrapper ----------------------------------
def naivenet_pallas(x_ncw, y_in, slab):
    """x_ncw: (B, num_joints*in_features, n_frames) torch layout;
    y_in: (B, num_joints*in_features); slab: prepacked weight slab."""
    assert x_ncw.shape == (BATCH, JF, N_FRAMES), "n_frames must equal sum(shift) + 3"
    assert y_in.shape == (BATCH, JF)

    # pre-im2col the expand conv (lane-batched: [tap][sample][feature]) and
    # merge y in as one extra row -> ONE input operand / ONE input DMA.
    cols = [x_ncw[b, :, t:t + T_OUT0].T
            for t in range(KERNEL) for b in range(BATCH)]
    xim = jnp.concatenate(cols, axis=1)                                 # (13, 48)
    xin = jnp.zeros((IN_ROWS, IN_COLS), jnp.float32)
    xin = xin.at[:T_OUT0, :KERNEL * BATCH * JF].set(xim)
    xin = xin.at[Y_ROW, :BATCH * JF].set(y_in.reshape(-1))

    out = pl.pallas_call(
        _kernel,
        out_shape=jax.ShapeDtypeStruct((8, SLAB_W), jnp.float32),
    )(xin, slab)

    row = out[0]
    accept = jnp.stack([row[b * HEAD_STRIDE] for b in range(BATCH)])[:, None]
    refine = jnp.stack([row[b * HEAD_STRIDE + 1:b * HEAD_STRIDE + 1 + OUT3]
                        for b in range(BATCH)])
    agnost = jnp.stack([row[b * HEAD_STRIDE + 1 + OUT3:b * HEAD_STRIDE + 1 + 2 * OUT3]
                        for b in range(BATCH)])
    return accept, refine, agnost


# ------------------------- parameter construction ------------------------
def _folded_bn(key, nc):
    kg, kb, km, kv = jax.random.split(key, 4)
    gamma = 1.0 + 0.1 * jax.random.normal(kg, (nc,), jnp.float32)
    beta = 0.1 * jax.random.normal(kb, (nc,), jnp.float32)
    mean = 0.1 * jax.random.normal(km, (nc,), jnp.float32)
    var = 1.0 + 0.1 * jax.random.uniform(kv, (nc,), jnp.float32)
    scale = gamma * jax.lax.rsqrt(var + BN_EPS)
    bias = beta - mean * scale
    return scale, bias


def _linear(key, fin, fout):
    kw, kb = jax.random.split(key)
    w = jax.random.normal(kw, (fout, fin), jnp.float32) * (2.0 / (fin + fout)) ** 0.5
    b = 0.1 * jax.random.normal(kb, (fout,), jnp.float32)
    return w, b                                    # torch layout (fout, fin), (fout,)


def init_params(key):
    ks = iter(jax.random.split(key, 24))
    nxt = lambda: next(ks)
    p = {}
    p["expand_w"] = jax.random.normal(nxt(), (CHANNELS, JF, KERNEL), jnp.float32) \
        * (2.0 / (JF * KERNEL)) ** 0.5
    p["expand_s"], p["expand_b"] = _folded_bn(nxt(), CHANNELS)

    dw, ds, db, sw, ss, sb = [], [], [], [], [], []
    for _ in range(N_BLOCKS):
        dw.append(jax.random.normal(nxt(), (CHANNELS, CHANNELS, KERNEL), jnp.float32)
                  * (2.0 / (CHANNELS * KERNEL)) ** 0.5)
        s, b = _folded_bn(nxt(), CHANNELS); ds.append(s); db.append(b)
        sw.append(jax.random.normal(nxt(), (CHANNELS, CHANNELS, 1), jnp.float32)
                  * (2.0 / CHANNELS) ** 0.5)
        s, b = _folded_bn(nxt(), CHANNELS); ss.append(s); sb.append(b)
    p["dilate_w"] = jnp.stack(dw); p["dilate_s"] = jnp.stack(ds); p["dilate_b"] = jnp.stack(db)
    p["smooth_w"] = jnp.stack(sw); p["smooth_s"] = jnp.stack(ss); p["smooth_b"] = jnp.stack(sb)

    p["lin_a_w"], p["lin_a_b"] = _linear(nxt(), CHANNELS + JF, CHANNELS)
    p["lin_b_w"], p["lin_b_b"] = _linear(nxt(), CHANNELS, CHANNELS)
    p["accept_w"], p["accept_b"] = _linear(nxt(), CHANNELS, 1)
    p["refine_w"], p["refine_b"] = _linear(nxt(), CHANNELS, OUT3)
    p["agnost_w"], p["agnost_b"] = _linear(nxt(), CHANNELS, OUT3)
    return p


# -------------------------- plain-JAX reference --------------------------
def _reference_single(x_tc, y_row, p):
    def conv_bn_relu(h, w, scale, bias, d):
        K = w.shape[2]
        t_out = h.shape[0] - (K - 1) * d
        acc = sum(h[t * d:t * d + t_out] @ w[:, :, t].T for t in range(K))
        return jnp.maximum(acc * scale[None, :] + bias[None, :], 0.0)

    h = conv_bn_relu(x_tc, p["expand_w"], p["expand_s"], p["expand_b"], 1)
    dil = INFLATION
    for k in range(N_BLOCKS):
        sh = (KERNEL - 1) * dil
        res = h[sh:]
        h = conv_bn_relu(h, p["dilate_w"][k], p["dilate_s"][k], p["dilate_b"][k], dil)
        h = jnp.maximum(h @ p["smooth_w"][k][:, :, 0].T
                        * p["smooth_s"][k][None, :] + p["smooth_b"][k][None, :], 0.0)
        h = h + res
        dil *= INFLATION
    feat = h                                                        # (1, C)
    cc = jnp.concatenate([feat, y_row[None, :]], axis=-1)
    a = jnp.maximum(cc @ p["lin_a_w"].T + p["lin_a_b"][None, :], 0.0)
    a = jnp.maximum(a @ p["lin_b_w"].T + p["lin_b_b"][None, :], 0.0)
    accept = a @ p["accept_w"].T + p["accept_b"][None, :]
    refine = a @ p["refine_w"].T + p["refine_b"][None, :]
    agnost = feat @ p["agnost_w"].T + p["agnost_b"][None, :]
    return accept, refine, agnost


def reference(x_btc, y_in, p):
    outs = [_reference_single(x_btc[b], y_in[b], p) for b in range(x_btc.shape[0])]
    return tuple(jnp.concatenate([o[i] for o in outs], axis=0) for i in range(3))


# ------------------------------- main ------------------------------------
if __name__ == "__main__":
    key = jax.random.PRNGKey(0)
    kx, ky, kp = jax.random.split(key, 3)

    # PyTorch-layout input: (batch, num_joints*in_features, n_frames)
    x_ncw = jax.random.normal(kx, (BATCH, JF, N_FRAMES), jnp.float32)
    y_in = jax.random.normal(ky, (BATCH, JF), jnp.float32)
    params = init_params(kp)

    # one-time weight packing (hoisted out of the forward pass)
    slab = pack_params(params)
    slab = jax.block_until_ready(slab)

    fwd = jax.jit(naivenet_pallas)
    accept, refine, agnost = fwd(x_ncw, y_in, slab)
    jax.block_until_ready((accept, refine, agnost))

    x_btc = jnp.transpose(x_ncw, (0, 2, 1))       # (B, T, JF) for the reference
    ra, rr, rg = reference(x_btc, y_in, params)
    assert np.allclose(np.asarray(accept), np.asarray(ra), atol=1e-4, rtol=1e-4)
    assert np.allclose(np.asarray(refine), np.asarray(rr), atol=1e-4, rtol=1e-4)
    assert np.allclose(np.asarray(agnost), np.asarray(rg), atol=1e-4, rtol=1e-4)

    print("KERNEL_OK")
</pallas_src>

<mosaic_0001>
module attributes {stable_mosaic.version = 11 : i64} {
  func.func @_kernel(%arg0: memref<16x64xf32, #tpu.memory_space<vmem>>, %arg1: memref<840x128xf32, #tpu.memory_space<vmem>>, %arg2: memref<8x128xf32, #tpu.memory_space<vmem>>) attributes {dimension_semantics = [], scalar_prefetch = 0 : i64, scratch_operands = 0 : i64, tpu.core_type = #tpu.core_type<tc>} {
    %c0 = arith.constant 0 : index
    %c0_0 = arith.constant 0 : index
    %0 = vector.load %arg0[%c0, %c0_0] : memref<16x64xf32, #tpu.memory_space<vmem>>, vector<13x48xf32>
    %c0_1 = arith.constant 0 : index
    %c0_2 = arith.constant 0 : index
    %1 = vector.load %arg1[%c0_1, %c0_2] : memref<840x128xf32, #tpu.memory_space<vmem>>, vector<48x64xf32>
    %cst = arith.constant dense<0.000000e+00> : vector<13x64xf32>
    %2 = tpu.matmul %0, %1, %cst {dimension_numbers = #tpu.dot_dimension_numbers<[1], [0], [0], [1], [0, 0, 1, 1], [], []>} : vector<13x48xf32>, vector<48x64xf32>, vector<13x64xf32> -> vector<13x64xf32>
    %c832 = arith.constant 832 : index
    %c0_3 = arith.constant 0 : index
    %3 = vector.load %arg1[%c832, %c0_3] : memref<840x128xf32, #tpu.memory_space<vmem>>, vector<1x64xf32>
    %4 = vector.broadcast %3 : vector<1x64xf32> to vector<13x64xf32>
    %5 = arith.addf %2, %4 : vector<13x64xf32>
    %cst_4 = arith.constant 0.000000e+00 : f32
    %6 = vector.broadcast %cst_4 : f32 to vector<13x64xf32>
    %7 = arith.maximumf %5, %6 : vector<13x64xf32>
    %8 = vector.extract_strided_slice %7 {offsets = [4, 0], sizes = [9, 64], strides = [1, 1]} : vector<13x64xf32> to vector<9x64xf32>
    %9 = vector.extract_strided_slice %7 {offsets = [0, 0], sizes = [9, 64], strides = [1, 1]} : vector<13x64xf32> to vector<9x64xf32>
    %10 = vector.extract_strided_slice %7 {offsets = [2, 0], sizes = [9, 64], strides = [1, 1]} : vector<13x64xf32> to vector<9x64xf32>
    %11 = vector.extract_strided_slice %7 {offsets = [4, 0], sizes = [9, 64], strides = [1, 1]} : vector<13x64xf32> to vector<9x64xf32>
    %12 = tpu.concatenate %9, %10, %11 in 1 : vector<9x64xf32>, vector<9x64xf32>, vector<9x64xf32> -> vector<9x192xf32>
    %c48 = arith.constant 48 : index
    %c0_5 = arith.constant 0 : index
    %13 = vector.load %arg1[%c48, %c0_5] : memref<840x128xf32, #tpu.memory_space<vmem>>, vector<192x64xf32>
    %cst_6 = arith.constant dense<0.000000e+00> : vector<9x64xf32>
    %14 = tpu.matmul %12, %13, %cst_6 {dimension_numbers = #tpu.dot_dimension_numbers<[1], [0], [0], [1], [0, 0, 1, 1], [], []>} : vector<9x192xf32>, vector<192x64xf32>, vector<9x64xf32> -> vector<9x64xf32>
    %c833 = arith.constant 833 : index
    %c0_7 = arith.constant 0 : index
    %15 = vector.load %arg1[%c833, %c0_7] : memref<840x128xf32, #tpu.memory_space<vmem>>, vector<1x64xf32>
    %16 = vector.broadcast %15 : vector<1x64xf32> to vector<9x64xf32>
    %17 = arith.addf %14, %16 : vector<9x64xf32>
    %cst_8 = arith.constant 0.000000e+00 : f32
    %18 = vector.broadcast %cst_8 : f32 to vector<9x64xf32>
    %19 = arith.maximumf %17, %18 : vector<9x64xf32>
    %c240 = arith.constant 240 : index
    %c0_9 = arith.constant 0 : index
    %20 = vector.load %arg1[%c240, %c0_9] : memref<840x128xf32, #tpu.memory_space<vmem>>, vector<64x64xf32>
    %cst_10 = arith.constant dense<0.000000e+00> : vector<9x64xf32>
    %21 = tpu.matmul %19, %20, %cst_10 {dimension_numbers = #tpu.dot_dimension_numbers<[1], [0], [0], [1], [0, 0, 1, 1], [], []>} : vector<9x64xf32>, vector<64x64xf32>, vector<9x64xf32> -> vector<9x64xf32>
    %c834 = arith.constant 834 : index
    %c0_11 = arith.constant 0 : index
    %22 = vector.load %arg1[%c834, %c0_11] : memref<840x128xf32, #tpu.memory_space<vmem>>, vector<1x64xf32>
    %23 = vector.broadcast %22 : vector<1x64xf32> to vector<9x64xf32>
    %24 = arith.addf %21, %23 : vector<9x64xf32>
    %cst_12 = arith.constant 0.000000e+00 : f32
    %25 = vector.broadcast %cst_12 : f32 to vector<9x64xf32>
    %26 = arith.maximumf %24, %25 : vector<9x64xf32>
    %27 = arith.addf %26, %8 : vector<9x64xf32>
    %28 = vector.extract_strided_slice %27 {offsets = [8, 0], sizes = [1, 64], strides = [1, 1]} : vector<9x64xf32> to vector<1x64xf32>
    %29 = vector.extract_strided_slice %27 {offsets = [0, 0], sizes = [1, 64], strides = [1, 1]} : vector<9x64xf32> to vector<1x64xf32>
    %30 = vector.extract_strided_slice %27 {offsets = [4, 0], sizes = [1, 64], strides = [1, 1]} : vector<9x64xf32> to vector<1x64xf32>
    %31 = vector.extract_strided_slice %27 {offsets = [8, 0], sizes = [1, 64], strides = [1, 1]} : vector<9x64xf32> to vector<1x64xf32>
    %32 = tpu.concatenate %29, %30, %31 in 1 : vector<1x64xf32>, vector<1x64xf32>, vector<1x64xf32> -> vector<1x192xf32>
    %c304 = arith.constant 304 : index
    %c0_13 = arith.constant 0 : index
    %33 = vector.load %arg1[%c304, %c0_13] : memref<840x128xf32, #tpu.memory_space<vmem>>, vector<192x64xf32>
    %cst_14 = arith.constant dense<0.000000e+00> : vector<1x64xf32>
    %34 = tpu.matmul %32, %33, %cst_14 {dimension_numbers = #tpu.dot_dimension_numbers<[1], [0], [0], [1], [0, 0, 1, 1], [], []>} : vector<1x192xf32>, vector<192x64xf32>, vector<1x64xf32> -> vector<1x64xf32>
    %c835 = arith.constant 835 : index
    %c0_15 = arith.constant 0 : index
    %35 = vector.load %arg1[%c835, %c0_15] : memref<840x128xf32, #tpu.memory_space<vmem>>, vector<1x64xf32>
    %36 = arith.addf %34, %35 : vector<1x64xf32>
    %cst_16 = arith.constant 0.000000e+00 : f32
    %37 = vector.broadcast %cst_16 : f32 to vector<1x64xf32>
    %38 = arith.maximumf %36, %37 : vector<1x64xf32>
    %c496 = arith.constant 496 : index
    %c0_17 = arith.constant 0 : index
    %39 = vector.load %arg1[%c496, %c0_17] : memref<840x128xf32, #tpu.memory_space<vmem>>, vector<64x64xf32>
    %cst_18 = arith.constant dense<0.000000e+00> : vector<1x64xf32>
    %40 = tpu.matmul %38, %39, %cst_18 {dimension_numbers = #tpu.dot_dimension_numbers<[1], [0], [0], [1], [0, 0, 1, 1], [], []>} : vector<1x64xf32>, vector<64x64xf32>, vector<1x64xf32> -> vector<1x64xf32>
    %c836 = arith.constant 836 : index
    %c0_19 = arith.constant 0 : index
    %41 = vector.load %arg1[%c836, %c0_19] : memref<840x128xf32, #tpu.memory_space<vmem>>, vector<1x64xf32>
    %42 = arith.addf %40, %41 : vector<1x64xf32>
    %cst_20 = arith.constant 0.000000e+00 : f32
    %43 = vector.broadcast %cst_20 : f32 to vector<1x64xf32>
    %44 = arith.maximumf %42, %43 : vector<1x64xf32>
    %45 = arith.addf %44, %28 : vector<1x64xf32>
    %c13 = arith.constant 13 : index
    %c0_21 = arith.constant 0 : index
    %46 = vector.load %arg0[%c13, %c0_21] : memref<16x64xf32, #tpu.memory_space<vmem>>, vector<1x16xf32>
    %47 = tpu.concatenate %45, %46 in 1 : vector<1x64xf32>, vector<1x16xf32> -> vector<1x80xf32>
    %c560 = arith.constant 560 : index
    %c0_22 = arith.constant 0 : index
    %48 = vector.load %arg1[%c560, %c0_22] : memref<840x128xf32, #tpu.memory_space<vmem>>, vector<80x64xf32>
    %cst_23 = arith.constant dense<0.000000e+00> : vector<1x64xf32>
    %49 = tpu.matmul %47, %48, %cst_23 {dimension_numbers = #tpu.dot_dimension_numbers<[1], [0], [0], [1], [0, 0, 1, 1], [], []>} : vector<1x80xf32>, vector<80x64xf32>, vector<1x64xf32> -> vector<1x64xf32>
    %c837 = arith.constant 837 : index
    %c0_24 = arith.constant 0 : index
    %50 = vector.load %arg1[%c837, %c0_24] : memref<840x128xf32, #tpu.memory_space<vmem>>, vector<1x64xf32>
    %51 = arith.addf %49, %50 : vector<1x64xf32>
    %cst_25 = arith.constant 0.000000e+00 : f32
    %52 = vector.broadcast %cst_25 : f32 to vector<1x64xf32>
    %53 = arith.maximumf %51, %52 : vector<1x64xf32>
    %c640 = arith.constant 640 : index
    %c0_26 = arith.constant 0 : index
    %54 = vector.load %arg1[%c640, %c0_26] : memref<840x128xf32, #tpu.memory_space<vmem>>, vector<64x64xf32>
    %cst_27 = arith.constant dense<0.000000e+00> : vector<1x64xf32>
    %55 = tpu.matmul %53, %54, %cst_27 {dimension_numbers = #tpu.dot_dimension_numbers<[1], [0], [0], [1], [0, 0, 1, 1], [], []>} : vector<1x64xf32>, vector<64x64xf32>, vector<1x64xf32> -> vector<1x64xf32>
    %c838 = arith.constant 838 : index
    %c0_28 = arith.constant 0 : index
    %56 = vector.load %arg1[%c838, %c0_28] : memref<840x128xf32, #tpu.memory_space<vmem>>, vector<1x64xf32>
    %57 = arith.addf %55, %56 : vector<1x64xf32>
    %cst_29 = arith.constant 0.000000e+00 : f32
    %58 = vector.broadcast %cst_29 : f32 to vector<1x64xf32>
    %59 = arith.maximumf %57, %58 : vector<1x64xf32>
    %60 = tpu.concatenate %59, %45 in 1 : vector<1x64xf32>, vector<1x64xf32> -> vector<1x128xf32>
    %c704 = arith.constant 704 : index
    %c0_30 = arith.constant 0 : index
    %61 = vector.load %arg1[%c704, %c0_30] : memref<840x128xf32, #tpu.memory_space<vmem>>, vector<128x128xf32>
    %cst_31 = arith.constant dense<0.000000e+00> : vector<1x128xf32>
    %62 = tpu.matmul %60, %61, %cst_31 {dimension_numbers = #tpu.dot_dimension_numbers<[1], [0], [0], [1], [0, 0, 1, 1], [], []>} : vector<1x128xf32>, vector<128x128xf32>, vector<1x128xf32> -> vector<1x128xf32>
    %c839 = arith.constant 839 : index
    %c0_32 = arith.constant 0 : index
    %63 = vector.load %arg1[%c839, %c0_32] : memref<840x128xf32, #tpu.memory_space<vmem>>, vector<1x128xf32>
    %64 = arith.addf %62, %63 : vector<1x128xf32>
    %65 = vector.shape_cast %64 : vector<1x128xf32> to vector<1x128xf32>
    %66 = vector.broadcast %65 : vector<1x128xf32> to vector<8x128xf32>
    %c0_33 = arith.constant 0 : index
    %c0_34 = arith.constant 0 : index
    %67 = vector.load %arg2[%c0_33, %c0_34] : memref<8x128xf32, #tpu.memory_space<vmem>>, vector<8x128xf32>
    tpu.vector_store %arg2[%c0_33, %c0_34], %66 {strides = array<i32>} : memref<8x128xf32, #tpu.memory_space<vmem>>, vector<8x128xf32>,
    return
  }
}

</mosaic_0001>

<bundles_post_ra>
// kernel: naivenet_pallas.1
= control target key start
LH: loop header
LB: loop body
LE: loop exit
PB: predicated region body
PF: predicated region fallthrough
CT: control target
= control target key end

     0   :  { %7 = vsyncpa [#allocation3], 0  ;;  %s1218_s9 = smov [#allocation2]   ;;  %s1349_s0 = inlined_call_operand.vmem [shape: f32[16,64], index: 0, kind: input, shape index: {}]   ;;  %s1350_s1 = inlined_call_operand.hbm [shape: f32[840,128], index: 1, kind: input, shape index: {}]   ;;  %s1351_s2 = inlined_call_operand.vmem [shape: f32[8,128], index: 2, kind: output, shape index: {}]  }
   0x1   :  { %s15_s10 = sshll.u32 %s1218_s9, 4  ;;  %s1194_s13 = scalar_lea.hbm %s1350_s1, 13440  ;;  %s16_s10 = int_to_ptr.vmem [resolvable:$true] %s15_s10 }
   0x2   :  { %p1195_p0 = scmp.ne.s32.totalorder %s1350_s1, %s1194_s13  ;;  %p1198_p1 = scmp.lt.u32.totalorder %s1194_s13, %s1350_s1 }
   0x4   :  { %p1200_p2 = pnand %p1198_p1, %p1195_p0 }
   0x6   :  { %1203 = shalt.err (!%p1200_p2)
}
   0x7   :  { %s1204_s18 = scalar_lea.vmem %s16_s10, 13440  ;;  %p1209_p4 = scmp.lt.s32.totalorder %s16_s10, %s16_s10 }
   0x8   :  { %p1205_p3 = scmp.ne.s32.totalorder %s16_s10, %s1204_s18  ;;  %p1210_p5 = scmp.lt.s32.totalorder %s1204_s18, %s1204_s18 }
   0xa   :  { %p1211_p6 = por %p1210_p5, %p1209_p4 }
   0xc   :  { %p1212_p7 = pnand %p1211_p6, %p1205_p3 }
   0xe   :  { %1215 = shalt.err (!%p1212_p7)
}
   0xf   :  { %s1219_s19 = smov 128   ;;  %s1220_s20 = smov 8  }
  0x10   :  { %21 = dma.hbm_to_vmem [thread:$0]  %s1350_s1, 13440, %s16_s10, [#allocation3], %s1219_s19, %s1219_s19, %s1220_s20  }
  0x11   :  { %1216 = dma.done.wait [#allocation3], 13440  }
  0x12   :  { %1217 = vsyncadd [#allocation3], 4294953856  ;;  %v27_v0 = vld [vmem:[#allocation2] sm:$0xff]  ;;  %v28_v1 = vld [vmem:[#allocation2 + $0x8] sm:$0xff]  ;;  %vm38_vm0 = vcmask 392192   ;;  %v1221_v14 = vmov 0.0|0.0  }
  0x13   :  { %v29_v2 = vld [vmem:[#allocation2 + $0x10] sm:$0xff]  ;;  %v1024_v3 = vpack.c.bf16 %v28_v1, %v27_v0  ;;  %v30_v4 = vld [vmem:[#allocation2 + $0x18] sm:$0xff]  ;;  %v31_v6 = vld [vmem:[#allocation2 + $0x20] sm:$0xff]  ;;  %1036 = vmatprep.subr.bf16.mxu1 %v1221_v14  ;;  %vm134_vm1 = vcmask 1043456   ;;  %vm124_vm2 = vcmask 1045504   ;;  %vm138_vm3 = vcmask 523264  }
  0x14   :  { %v1028_v5 = vpack.c.bf16 %v30_v4, %v29_v2  ;;  %v32_v7 = vld [vmem:[#allocation2 + $0x28] sm:$0xff]  ;;  %v25_v8 = vld [vmem:[%s1349_s0] sm:$0xff]  ;;  %v141_v11 = vld [vmem:[#allocation2 + $0x30] sm:$0xff]  ;;  %s1222_s26 = smov 64   ;;  %vm1223_vm4 = vmmov 0   ;;  %vm557_vm5 = vcmask 654336  }
  0x15   :  { %1025 = vmatprep.subr.bf16.mxu0 %v1024_v3  ;;  %906 = vmatprep.mubr.msk.f32.mxu0 %vm38_vm0, %v25_v8  ;;  %v1032_v9 = vpack.c.bf16 %v32_v7, %v31_v6  ;;  %v26_v10 = vld [vmem:[%s1349_s0 + $0x8] sm:$0x1f]  ;;  %v142_v12 = vld [vmem:[#allocation2 + $0x38] sm:$0xff]  ;;  %v143_v13 = vld [vmem:[#allocation2 + $0x40] sm:$0xff] }
  0x16   :  { %1027 = vmatpush3.bf16.msra.mxu0 %v1024_v3  ;;  %v1037_v15 = vpack.c.bf16 %v142_v12, %v141_v11  ;;  %v144_v16 = vld [vmem:[#allocation2 + $0x48] sm:$0xff]  ;;  %v145_v18 = vld [vmem:[#allocation2 + $0x50] sm:$0xff]  ;;  %v146_v19 = vld [vmem:[#allocation2 + $0x58] sm:$0xff] }
  0x17   :  { %1029 = vmatprep.subr.bf16.mxu0 %v1028_v5  ;;  %v1040_v17 = vpack.c.bf16 %v144_v16, %v143_v13  ;;  %v1043_v20 = vpack.c.bf16 %v146_v19, %v145_v18  ;;  %v147_v21 = vld [vmem:[#allocation2 + $0x60] sm:$0xff]  ;;  %v148_v22 = vld [vmem:[#allocation2 + $0x68] sm:$0xff]  ;;  %v149_v24 = vld [vmem:[#allocation2 + $0x70] sm:$0xff] }
  0x18   :  { %1038 = vmatpush1.bf16.msra.mxu1 %v1037_v15  ;;  %v1046_v23 = vpack.c.bf16 %v148_v22, %v147_v21  ;;  %v150_v25 = vld [vmem:[#allocation2 + $0x78] sm:$0xff]  ;;  %v151_v27 = vld [vmem:[#allocation2 + $0x80] sm:$0xff]  ;;  %v152_v28 = vld [vmem:[#allocation2 + $0x88] sm:$0xff] }
  0x19   :  { %1039 = vmatprep.subr.bf16.mxu1 %v1221_v14  ;;  %v1049_v26 = vpack.c.bf16 %v150_v25, %v149_v24  ;;  %v1052_v29 = vpack.c.bf16 %v152_v28, %v151_v27  ;;  %v153_v30 = vld [vmem:[#allocation2 + $0x90] sm:$0xff]  ;;  %v154_v31 = vld [vmem:[#allocation2 + $0x98] sm:$0xff]  ;;  %v155_v33 = vld [vmem:[#allocation2 + $0xa0] sm:$0xff] }
  0x1a   :  { %1031 = vmatpush3.bf16.msra.mxu0 %v1028_v5  ;;  %v1055_v32 = vpack.c.bf16 %v154_v31, %v153_v30  ;;  %v156_v34 = vld [vmem:[#allocation2 + $0xa8] sm:$0xff]  ;;  %v157_v36 = vld [vmem:[#allocation2 + $0xb0] sm:$0xff]  ;;  %v158_v37 = vld [vmem:[#allocation2 + $0xb8] sm:$0xff] }
  0x1b   :  { %1033 = vmatprep.subr.bf16.mxu0 %v1032_v9  ;;  %v1058_v35 = vpack.c.bf16 %v156_v34, %v155_v33  ;;  %v1061_v38 = vpack.c.bf16 %v158_v37, %v157_v36  ;;  %v159_v39 = vld [vmem:[#allocation2 + $0xc0] sm:$0xff]  ;;  %v160_v40 = vld [vmem:[#allocation2 + $0xc8] sm:$0xff]  ;;  %v161_v42 = vld [vmem:[#allocation2 + $0xd0] sm:$0xff] }
  0x1c   :  { %1041 = vmatpush1.bf16.msra.mxu1 %v1040_v17  ;;  %v1064_v41 = vpack.c.bf16 %v160_v40, %v159_v39  ;;  %v162_v43 = vld [vmem:[#allocation2 + $0xd8] sm:$0xff]  ;;  %v163_v45 = vld [vmem:[#allocation2 + $0xe0] sm:$0xff]  ;;  %v164_v46 = vld [vmem:[#allocation2 + $0xe8] sm:$0xff] }
  0x1d   :  { %1042 = vmatprep.subr.bf16.mxu1 %v1221_v14  ;;  %v1067_v44 = vpack.c.bf16 %v162_v43, %v161_v42  ;;  %v1070_v47 = vpack.c.bf16 %v164_v46, %v163_v45  ;;  %v817_v48 = vld [vmem:[#allocation2 + $0x340] ss:$0 sm:$0xff]  ;;  %v251_v52 = vld [vmem:[#allocation2 + $0xf0] sm:$0xff]  ;;  %v252_v53 = vld [vmem:[#allocation2 + $0xf8] sm:$0xff] }
  0x1e   :  { %1035 = vmatpush3.bf16.msra.mxu0 %v1032_v9  ;;  %v253_v54 = vld [vmem:[#allocation2 + $0x100] sm:$0xff]  ;;  %v1072_v56 = vpack.c.bf16 %v252_v53, %v251_v52  ;;  %v254_v57 = vld [vmem:[#allocation2 + $0x108] sm:$0xff]  ;;  %v255_v7 = vld [vmem:[#allocation2 + $0x110] sm:$0xff] }
  0x1f   :  { %v1076_v59 = vpack.c.bf16 %v254_v57, %v253_v54  ;;  %v256_v8 = vld [vmem:[#allocation2 + $0x118] sm:$0xff]  ;;  %v258_v11 = vld [vmem:[#allocation2 + $0x128] sm:$0xff]  ;;  %v820_v13 = vld [vmem:[#allocation2 + $0x341] ss:$0 sm:$0xff] }
  0x20   :  { %1044 = vmatpush1.bf16.msra.mxu1 %v1043_v20  ;;  %1073 = vmatprep.subr.bf16.mxu0 %v1072_v56  ;;  %v1080_v9 = vpack.c.bf16 %v256_v8, %v255_v7  ;;  %v358_v24 = vld [vmem:[#allocation2 + $0x138] sm:$0xff]  ;;  %v359_v25 = vld [vmem:[#allocation2 + $0x140] sm:$0xff]  ;;  %v360_v27 = vld [vmem:[#allocation2 + $0x148] sm:$0xff] }
  0x21   :  { %907 = vmatmul.mubr.msk.f32.vlgmr.msra.gmra.mrb[0].mxu0 %vm38_vm0, %v26_v10  ;;  %1045 = vmatprep.subr.bf16.mxu1 %v1221_v14  ;;  %v257_v10 = vld [vmem:[#allocation2 + $0x120] sm:$0xff]  ;;  %v1092_v28 = vpack.c.bf16 %v360_v27, %v359_v25  ;;  %v362_v30 = vld [vmem:[#allocation2 + $0x158] sm:$0xff]  ;;  %v364_v33 = vld [vmem:[#allocation2 + $0x168] sm:$0xff] }
  0x22   :  { %1075 = vmatpush3.bf16.msra.mxu0 %v1072_v56  ;;  %v1084_v12 = vpack.c.bf16 %v258_v11, %v257_v10  ;;  %v366_v36 = vld [vmem:[#allocation2 + $0x178] sm:$0xff]  ;;  %v368_v39 = vld [vmem:[#allocation2 + $0x188] sm:$0xff]  ;;  %v377_v53 = vld [vmem:[#allocation2 + $0x1d0] sm:$0xff] }
  0x23   :  { %1077 = vmatprep.subr.bf16.mxu0 %v1076_v59  ;;  %v370_v42 = vld [vmem:[#allocation2 + $0x198] sm:$0xff]  ;;  %v372_v45 = vld [vmem:[#allocation2 + $0x1a8] sm:$0xff]  ;;  %v379_v56 = vld [vmem:[#allocation2 + $0x1e0] sm:$0xff] }
  0x24   :  { %1047 = vmatpush1.bf16.msra.mxu1 %v1046_v23  ;;  %v357_v23 = vld [vmem:[#allocation2 + $0x130] sm:$0xff]  ;;  %v378_v54 = vld [vmem:[#allocation2 + $0x1d8] sm:$0xff]  ;;  %v380_v57 = vld [vmem:[#allocation2 + $0x1e8] sm:$0xff] }
  0x25   :  { %1048 = vmatprep.subr.bf16.mxu1 %v1221_v14  ;;  %v456_v7 = vld [vmem:[#allocation2 + $0x1f0] sm:$0xff]  ;;  %v457_v8 = vld [vmem:[#allocation2 + $0x1f8] sm:$0xff]  ;;  %v458_v11 = vld [vmem:[#allocation2 + $0x200] sm:$0xff] }
  0x26   :  { %1079 = vmatpush3.bf16.msra.mxu0 %v1076_v59  ;;  %v823_v59 = vld [vmem:[#allocation2 + $0x342] ss:$0 sm:$0xff] }
  0x27   :  { %1081 = vmatprep.subr.bf16.mxu0 %v1080_v9  ;;  %v548_v25 = vld [vmem:[#allocation2 + $0x240] sm:$0xff] }
  0x28   :  { %1050 = vmatpush1.bf16.msra.mxu1 %v1049_v26  ;;  %v1089_v26 = vpack.c.bf16 %v358_v24, %v357_v23  ;;  %v547_v23 = vld [vmem:[#allocation2 + $0x238] sm:$0xff] }
  0x29   :  { %1051 = vmatprep.subr.bf16.mxu1 %v1221_v14 }
  0x2a   :  { %1083 = vmatpush3.bf16.msra.mxu0 %v1080_v9  ;;  %v1125_v9 = vpack.c.bf16 %v457_v8, %v456_v7  ;;  %v725_v7 = vld [vmem:[#allocation2 + $0x2e8] sm:$0xff] }
  0x2b   :  { %1085 = vmatprep.subr.bf16.mxu0 %v1084_v12 }
  0x2c   :  { %1053 = vmatpush1.bf16.msra.mxu1 %v1052_v29  ;;  %v361_v29 = vld [vmem:[#allocation2 + $0x150] sm:$0xff] }
  0x2d   :  { %1054 = vmatprep.subr.bf16.mxu1 %v1221_v14  ;;  %v1095_v31 = vpack.c.bf16 %v362_v30, %v361_v29  ;;  %v551_v29 = vld [vmem:[#allocation2 + $0x258] sm:$0xff] }
  0x2e   :  { %1087 = vmatpush3.bf16.msra.mxu0 %v1084_v12  ;;  %v459_v12 = vld [vmem:[#allocation2 + $0x208] sm:$0xff] }
  0x2f   :  { %1088 = vmatprep.subr.bf16.mxu0 %v1221_v14 }
  0x30   :  { %1056 = vmatpush1.bf16.msra.mxu1 %v1055_v32  ;;  %v363_v32 = vld [vmem:[#allocation2 + $0x160] sm:$0xff] }
  0x31   :  { %1057 = vmatprep.subr.bf16.mxu1 %v1221_v14  ;;  %v1098_v34 = vpack.c.bf16 %v364_v33, %v363_v32 }
  0x34   :  { %1059 = vmatpush1.bf16.msra.mxu1 %v1058_v35  ;;  %v365_v35 = vld [vmem:[#allocation2 + $0x170] sm:$0xff] }
  0x35   :  { %1060 = vmatprep.subr.bf16.mxu1 %v1221_v14  ;;  %v1101_v37 = vpack.c.bf16 %v366_v36, %v365_v35  ;;  %v552_v36 = vld [vmem:[#allocation2 + $0x260] sm:$0xff] }
  0x38   :  { %1062 = vmatpush1.bf16.msra.mxu1 %v1061_v38  ;;  %v367_v38 = vld [vmem:[#allocation2 + $0x180] sm:$0xff] }
  0x39   :  { %1063 = vmatprep.subr.bf16.mxu1 %v1221_v14  ;;  %v1104_v40 = vpack.c.bf16 %v368_v39, %v367_v38  ;;  %v554_v39 = vld [vmem:[#allocation2 + $0x270] sm:$0xff] }
  0x3c   :  { %1065 = vmatpush1.bf16.msra.mxu1 %v1064_v41  ;;  %v369_v41 = vld [vmem:[#allocation2 + $0x190] sm:$0xff] }
  0x3d   :  { %1066 = vmatprep.subr.bf16.mxu1 %v1221_v14  ;;  %v1107_v43 = vpack.c.bf16 %v370_v42, %v369_v41  ;;  %v632_v42 = vld [vmem:[#allocation2 + $0x280] sm:$0xff] }
  0x40   :  { %1068 = vmatpush1.bf16.msra.mxu1 %v1067_v44  ;;  %v371_v44 = vld [vmem:[#allocation2 + $0x1a0] sm:$0xff] }
  0x41   :  { %1069 = vmatprep.subr.bf16.mxu1 %v1221_v14  ;;  %v1110_v46 = vpack.c.bf16 %v372_v45, %v371_v44  ;;  %v634_v44 = vld [vmem:[#allocation2 + $0x290] sm:$0xff] }
  0x44   :  { %1071 = vmatpush1.bf16.msra.mxu1 %v1070_v47  ;;  %v373_v47 = vld [vmem:[#allocation2 + $0x1b0] sm:$0xff] }
  0x45   :  { %1136 = vmatprep.subr.bf16.mxu1 %v1221_v14 }
  0xf4   :  { %v908_v49 = vpop.f32.mrb[0].mxu0 }
  0xf5   :  { %v117_v50 = vadd.f32 %v908_v49, %v817_v48  ;;  %v111_v51 = vpop.f32.mrb[1].mxu0 }
  0xf6   :  { %v112_v55 = vadd.f32 %v817_v48, %v111_v51  ;;  %v374_v48 = vld [vmem:[#allocation2 + $0x1b8] sm:$0xff]  ;;  %v376_v51 = vld [vmem:[#allocation2 + $0x1c8] sm:$0xff] }
  0xf7   :  { %v121_v58 = vmax.f32 %v117_v50, 0.0  ;;  %v1113_v49 = vpack.c.bf16 %v374_v48, %v373_v47  ;;  %v375_v50 = vld [vmem:[#allocation2 + $0x1c0] sm:$0xff] }
  0xf8   :  { %v120_v60 = vmax.f32 %v112_v55, 0.0  ;;  %v1116_v52 = vpack.c.bf16 %v376_v51, %v375_v50  ;;  %v1119_v55 = vpack.c.bf16 %v378_v54, %v377_v53  ;;  %v636_v48 = vld [vmem:[#allocation2 + $0x2a0] sm:$0xff] }
  0xf9   :  { %v1273_v61 = vrot.slane %v121_v58, 4  ;;  %v126_v62 = vrot.slane %v121_v58, 2  ;;  %v464_v50 = vld [vmem:[#allocation2 + $0x344] sm:$0x1] }
  0xfa   :  { %v135_v63 = vrot.slane %v120_v60, 4  ;;  %v125_v0 = vrot.slane %v120_v60, 2 }
  0xfc   :  { %v1276_v1 = vsel %vm134_vm1, %v135_v63, %v1273_v61  ;;  %v127_v2 = vsel %vm124_vm2, %v125_v0, %v126_v62 }
  0xfd   :  { %821 = vmatprep.mubr.msk.f32.mxu1 %vm138_vm3, %v1276_v1  ;;  %128 = vrot.lane.b32.xlu0 %v127_v2, %s1222_s26 }
 0x101   :  { %130 = vrot.lane.b32.xlu0 %v126_v62, %s1222_s26 }
 0x16f   :  { %v129_v3 = vpop.permute.xlu0 %128 }
 0x170   :  { %v139_v4 = vsel %vm138_vm3, %v120_v60, %v129_v3 }
 0x171   :  { %239 = vmatmul.mubr.f32.vlgmr.msra.gmra.mrb[0].mxu1 %v139_v4 }
 0x172   :  { %822 = vmatprep.mubr.msk.f32.mxu1 %vm138_vm3, %v1273_v61 }
 0x173   :  { %v131_v5 = vpop.permute.xlu0 %130 }
 0x174   :  { %v140_v6 = vsel %vm138_vm3, %v121_v58, %v131_v5  ;;  %v1122_v58 = vpack.c.bf16 %v380_v57, %v379_v56 }
 0x175   :  { %244 = vmatmul.mubr.f32.gmra.mrb[2].mxu1 %v140_v6 }
 0x244   :  { %v240_v15 = vpop.f32.mrb[0].mxu1 }
 0x245   :  { %v241_v16 = vadd.f32 %v820_v13, %v240_v15  ;;  %v242_v17 = vpop.f32.mrb[1].mxu1  ;;  %v461_v15 = vld [vmem:[#allocation2 + $0x218] sm:$0xff] }
 0x246   :  { %v462_v17 = vld [vmem:[#allocation2 + $0x220] sm:$0xff] }
 0x247   :  { %v249_v18 = vmax.f32 %v241_v16, 0.0 }
 0x248   :  { %v245_v19 = vpop.f32.mrb[2].mxu1 }
 0x249   :  { %v246_v20 = vadd.f32 %v820_v13, %v245_v19  ;;  %v247_v21 = vpop.f32.mrb[3].mxu1  ;;  %925 = vmatprep.mubr.msk.f32.mxu0 %vm138_vm3, %v249_v18  ;;  %v463_v18 = vld [vmem:[#allocation2 + $0x228] sm:$0xff] }
 0x24a   :  { %v1134_v19 = vpack.c.bf16 %v463_v18, %v462_v17  ;;  %v540_v21 = vld [vmem:[%s1349_s0 + $0xd] sm:$0x1]  ;;  %v732_v17 = vld [vmem:[#allocation2 + $0x320] sm:$0xff] }
 0x24b   :  { %v250_v22 = vmax.f32 %v246_v20, 0.0  ;;  %v1224_v20 = vmov 0.0   ;;  %v733_v18 = vld [vmem:[#allocation2 + $0x328] sm:$0xff] }
 0x24c   :  { %967 = vmatprep.mubr.msk.f32.mxu1 %vm1223_vm4, %v1224_v20 }
 0x24d   :  { %926 = vmatmul.mubr.msk.f32.vlgmr.msra.gmra.mrb[2].mxu0 %vm138_vm3, %v250_v22  ;;  %v546_v22 = vld [vmem:[#allocation2 + $0x230] sm:$0xff] }
 0x24e   :  { %1090 = vmatpush1.bf16.msra.mxu0 %v1089_v26  ;;  %v1137_v24 = vpack.c.bf16 %v547_v23, %v546_v22  ;;  %v549_v26 = vld [vmem:[#allocation2 + $0x248] sm:$0xff] }
 0x24f   :  { %1091 = vmatprep.subr.bf16.mxu0 %v1221_v14  ;;  %v1140_v27 = vpack.c.bf16 %v549_v26, %v548_v25  ;;  %v734_v25 = vld [vmem:[#allocation2 + $0x330] sm:$0xff]  ;;  %v735_v26 = vld [vmem:[#allocation2 + $0x338] sm:$0xff] }
 0x250   :  { %1138 = vmatpush3.bf16.msra.mxu1 %v1137_v24 }
 0x251   :  { %1139 = vmatprep.subr.bf16.mxu1 %v1221_v14 }
 0x252   :  { %1093 = vmatpush1.bf16.msra.mxu0 %v1092_v28  ;;  %v550_v28 = vld [vmem:[#allocation2 + $0x250] sm:$0xff] }
 0x253   :  { %1094 = vmatprep.subr.bf16.mxu0 %v1221_v14  ;;  %v1143_v30 = vpack.c.bf16 %v551_v29, %v550_v28  ;;  %v640_v28 = vld [vmem:[#allocation2 + $0x346] sm:$0x1] }
 0x254   :  { %1141 = vmatpush3.bf16.msra.mxu1 %v1140_v27  ;;  %v1185_v27 = vpack.c.bf16 %v735_v26, %v734_v25 }
 0x255   :  { %1142 = vmatprep.subr.bf16.mxu1 %v1221_v14 }
 0x256   :  { %1096 = vmatpush1.bf16.msra.mxu0 %v1095_v31  ;;  %v381_v31 = vld [vmem:[#allocation2 + $0x343] sm:$0x1] }
 0x257   :  { %1097 = vmatprep.subr.bf16.mxu0 %v1221_v14 }
 0x258   :  { %1144 = vmatpush3.bf16.msra.mxu1 %v1143_v30 }
 0x259   :  { %1145 = vmatprep.subr.bf16.mxu1 %v1221_v14 }
 0x25a   :  { %1099 = vmatpush1.bf16.msra.mxu0 %v1098_v34 }
 0x25b   :  { %1100 = vmatprep.subr.bf16.mxu0 %v1221_v14 }
 0x25e   :  { %1102 = vmatpush1.bf16.msra.mxu0 %v1101_v37  ;;  %v553_v37 = vld [vmem:[#allocation2 + $0x268] sm:$0xff] }
 0x25f   :  { %1103 = vmatprep.subr.bf16.mxu0 %v1221_v14  ;;  %v1146_v38 = vpack.c.bf16 %v553_v37, %v552_v36  ;;  %v736_v36 = vld [vmem:[#allocation2 + $0x347] sm:$0x1] }
 0x261   :  { %1147 = vmatpush3.bf16.msra.mxu1 %v1146_v38 }
 0x262   :  { %1105 = vmatpush1.bf16.msra.mxu0 %v1104_v40  ;;  %1148 = vmatprep.subr.bf16.mxu1 %v1221_v14  ;;  %v555_v40 = vld [vmem:[#allocation2 + $0x278] sm:$0xff] }
 0x263   :  { %1106 = vmatprep.subr.bf16.mxu0 %v1221_v14  ;;  %v1149_v41 = vpack.c.bf16 %v555_v40, %v554_v39 }
 0x265   :  { %1150 = vmatpush3.bf16.msra.mxu1 %v1149_v41 }
 0x266   :  { %1108 = vmatpush1.bf16.msra.mxu0 %v1107_v43  ;;  %1163 = vmatprep.subr.bf16.mxu1 %v1221_v14  ;;  %v633_v43 = vld [vmem:[#allocation2 + $0x288] sm:$0xff] }
 0x267   :  { %1109 = vmatprep.subr.bf16.mxu0 %v1221_v14  ;;  %v1152_v45 = vpack.c.bf16 %v633_v43, %v632_v42 }
 0x26a   :  { %1111 = vmatpush1.bf16.msra.mxu0 %v1110_v46  ;;  %v635_v46 = vld [vmem:[#allocation2 + $0x298] sm:$0xff] }
 0x26b   :  { %1112 = vmatprep.subr.bf16.mxu0 %v1221_v14  ;;  %v1155_v47 = vpack.c.bf16 %v635_v46, %v634_v44 }
 0x26e   :  { %1114 = vmatpush1.bf16.msra.mxu0 %v1113_v49  ;;  %v637_v49 = vld [vmem:[#allocation2 + $0x2a8] sm:$0xff] }
 0x26f   :  { %1115 = vmatprep.subr.bf16.mxu0 %v1221_v14 }
 0x272   :  { %1117 = vmatpush1.bf16.msra.mxu0 %v1116_v52  ;;  %v1158_v52 = vpack.c.bf16 %v637_v49, %v636_v48 }
 0x273   :  { %1118 = vmatprep.subr.bf16.mxu0 %v1221_v14 }
 0x276   :  { %1120 = vmatpush1.bf16.msra.mxu0 %v1119_v55 }
 0x277   :  { %1121 = vmatprep.subr.bf16.mxu0 %v1221_v14 }
 0x27a   :  { %1123 = vmatpush1.bf16.msra.mxu0 %v1122_v58 }
 0x27b   :  { %1124 = vmatprep.subr.bf16.mxu0 %v1221_v14 }
 0x320   :  { %v927_v60 = vpop.f32.mrb[2].mxu0 }
 0x321   :  { %v342_v62 = vadd.f32 %v927_v60, %v823_v59  ;;  %v336_v63 = vpop.f32.mrb[3].mxu0  ;;  %v639_v60 = vld [vmem:[#allocation2 + $0x2b8] sm:$0xff] }
 0x322   :  { %v337_v0 = vadd.f32 %v823_v59, %v336_v63  ;;  %v638_v59 = vld [vmem:[#allocation2 + $0x2b0] sm:$0xff]  ;;  %v720_v63 = vld [vmem:[#allocation2 + $0x2c0] sm:$0xff] }
 0x323   :  { %v346_v2 = vmax.f32 %v342_v62, 0.0  ;;  %v1161_v62 = vpack.c.bf16 %v639_v60, %v638_v59 }
 0x324   :  { %v345_v3 = vmax.f32 %v337_v0, 0.0  ;;  %v721_v0 = vld [vmem:[#allocation2 + $0x2c8] sm:$0xff] }
 0x325   :  { %v1302_v4 = vadd.f32 %v346_v2, %v1273_v61  ;;  %v1128_v61 = vpack.c.bf16 %v459_v12, %v458_v11  ;;  %v722_v2 = vld [vmem:[#allocation2 + $0x2d0] sm:$0xff]  ;;  %v728_v12 = vld [vmem:[#allocation2 + $0x300] sm:$0xff] }
 0x326   :  { %v349_v5 = vadd.f32 %v345_v3, %v1276_v1  ;;  %v460_v1 = vld [vmem:[#allocation2 + $0x210] sm:$0xff]  ;;  %v1164_v3 = vpack.c.bf16 %v721_v0, %v720_v63 }
 0x327   :  { %826 = vmatprep.mubr.msk.f32.mxu0 %vm138_vm3, %v1302_v4  ;;  %v1131_v16 = vpack.c.bf16 %v461_v15, %v460_v1  ;;  %v730_v1 = vld [vmem:[#allocation2 + $0x310] sm:$0xff]  ;;  %v731_v15 = vld [vmem:[#allocation2 + $0x318] sm:$0xff] }
 0x328   :  { %v352_v6 = vrot.slane %v349_v5, 4 }
 0x32a   :  { %353 = vrot.lane.b32.xlu1 %v352_v6, %s1222_s26  ;;  %v724_v6 = vld [vmem:[#allocation2 + $0x2e0] sm:$0xff] }
 0x32b   :  { %v1170_v8 = vpack.c.bf16 %v725_v7, %v724_v6 }
 0x32e   :  { %542 = vrot.lane.b32.xlu1 %v540_v21, %s1222_s26 }
 0x39c   :  { %v354_v10 = vpop.permute.xlu1 %353 }
 0x39d   :  { %v356_v13 = vsel %vm138_vm3, %v349_v5, %v354_v10  ;;  %v727_v10 = vld [vmem:[#allocation2 + $0x2f8] sm:$0xff] }
 0x39e   :  { %450 = vmatmul.mubr.f32.vlgmr.msra.gmra.mrb[4].mxu0 %v356_v13  ;;  %v729_v13 = vld [vmem:[#allocation2 + $0x308] sm:$0xff] }
 0x39f   :  { %1126 = vmatpush3.bf16.msra.mxu0 %v1125_v9  ;;  %944 = vmatprep.mubr.msk.f32.mxu0 %vm1223_vm4, %v1224_v20  ;;  %v726_v9 = vld [vmem:[#allocation2 + $0x2f0] sm:$0xff] }
 0x3a0   :  { %1127 = vmatprep.subr.bf16.mxu0 %v1221_v14  ;;  %v543_v56 = vpop.permute.xlu1 %542  ;;  %v1173_v11 = vpack.c.bf16 %v727_v10, %v726_v9 }
 0x3a3   :  { %1129 = vmatpush3.bf16.msra.mxu0 %v1128_v61  ;;  %v1176_v61 = vpack.c.bf16 %v729_v13, %v728_v12 }
 0x3a4   :  { %1130 = vmatprep.subr.bf16.mxu0 %v1221_v14 }
 0x3a7   :  { %1132 = vmatpush3.bf16.msra.mxu0 %v1131_v16  ;;  %v1179_v16 = vpack.c.bf16 %v731_v15, %v730_v1 }
 0x3a8   :  { %1133 = vmatprep.subr.bf16.mxu0 %v1221_v14 }
 0x3ab   :  { %1135 = vmatpush3.bf16.msra.mxu0 %v1134_v19  ;;  %v1182_v19 = vpack.c.bf16 %v733_v18, %v732_v17 }
 0x3ac   :  { %1151 = vmatprep.subr.bf16.mxu0 %v1221_v14 }
 0x471   :  { %v451_v32 = vpop.f32.mrb[4].mxu0 }
 0x472   :  { %v452_v33 = vadd.f32 %v451_v32, %v381_v31  ;;  %v453_v34 = vpop.f32.mrb[5].mxu0 }
 0x474   :  { %v455_v35 = vmax.f32 %v452_v33, 0.0 }
 0x476   :  { %945 = vmatmul.mubr.msk.f32.vlgmr.msra.gmra.mrb[6].mxu0 %vm138_vm3, %v455_v35 }
 0x477   :  { %986 = vmatprep.mubr.msk.f32.mxu0 %vm1223_vm4, %v1224_v20  ;;  %1153 = vmatpush3.bf16.msra.mxu0 %v1152_v45 }
 0x478   :  { %1154 = vmatprep.subr.bf16.mxu0 %v1221_v14 }
 0x47b   :  { %1156 = vmatpush3.bf16.msra.mxu0 %v1155_v47 }
 0x47c   :  { %1157 = vmatprep.subr.bf16.mxu0 %v1221_v14 }
 0x47f   :  { %1159 = vmatpush3.bf16.msra.mxu0 %v1158_v52 }
 0x480   :  { %1160 = vmatprep.subr.bf16.mxu0 %v1221_v14 }
 0x483   :  { %1162 = vmatpush3.bf16.msra.mxu0 %v1161_v62 }
 0x549   :  { %v534_v51 = vpop.f32.mrb[6].mxu0 }
 0x54a   :  { %v535_v53 = vadd.f32 %v534_v51, %v464_v50  ;;  %v946_v54 = vpop.f32.mrb[7].mxu0 }
 0x54c   :  { %v538_v55 = vmax.f32 %v535_v53, 0.0 }
 0x54e   :  { %v539_v57 = vadd.f32 %v538_v55, %v1302_v4  ;;  %v723_v4 = vld [vmem:[#allocation2 + $0x2d8] sm:$0xff] }
 0x54f   :  { %v1167_v5 = vpack.c.bf16 %v723_v4, %v722_v2 }
 0x550   :  { %v545_v58 = vsel %vm138_vm3, %v539_v57, %v543_v56  ;;  %716 = vrot.lane.b32.xlu0 %v539_v57, %s1222_s26 }
 0x551   :  { %968 = vmatmul.mubr.msk.f32.vlgmr.msra.gmra.mrb[4].mxu1 %vm557_vm5, %v545_v58 }
 0x552   :  { %1021 = vmatprep.mubr.msk.f32.mxu1 %vm1223_vm4, %v1224_v20  ;;  %1165 = vmatpush3.bf16.msra.mxu1 %v1164_v3  ;;  %v556_v20 = vld [vmem:[#allocation2 + $0x345] sm:$0x1] }
 0x553   :  { %1166 = vmatprep.subr.bf16.mxu1 %v1221_v14 }
 0x556   :  { %1168 = vmatpush3.bf16.msra.mxu1 %v1167_v5 }
 0x557   :  { %1169 = vmatprep.subr.bf16.mxu1 %v1221_v14 }
 0x55a   :  { %1171 = vmatpush3.bf16.msra.mxu1 %v1170_v8 }
 0x55b   :  { %1172 = vmatprep.subr.bf16.mxu1 %v1221_v14 }
 0x55e   :  { %1174 = vmatpush3.bf16.msra.mxu1 %v1173_v11 }
 0x55f   :  { %1175 = vmatprep.subr.bf16.mxu1 %v1221_v14 }
 0x562   :  { %1177 = vmatpush3.bf16.msra.mxu1 %v1176_v61 }
 0x563   :  { %1178 = vmatprep.subr.bf16.mxu1 %v1221_v14 }
 0x566   :  { %1180 = vmatpush3.bf16.msra.mxu1 %v1179_v16 }
 0x567   :  { %1181 = vmatprep.subr.bf16.mxu1 %v1221_v14 }
 0x56a   :  { %1183 = vmatpush3.bf16.msra.mxu1 %v1182_v19 }
 0x56b   :  { %1184 = vmatprep.subr.bf16.mxu1 %v1221_v14  ;;  %v807_v14 = vlaneseq }
 0x56d   :  { %v808_v35 = vshrl.u32 %v807_v14, 7 }
 0x56e   :  { %1186 = vmatpush3.bf16.msra.mxu1 %v1185_v27 }
 0x56f   :  { %v809_v37 = vsub.s32 0, %v808_v35 }
 0x5c2   :  { %v717_v33 = vpop.permute.xlu0 %716 }
 0x624   :  { %v627_v21 = vpop.f32.mrb[4].mxu1 }
 0x625   :  { %v628_v22 = vadd.f32 %v627_v21, %v556_v20  ;;  %v969_v23 = vpop.f32.mrb[5].mxu1 }
 0x627   :  { %v631_v24 = vmax.f32 %v628_v22, 0.0 }
 0x629   :  { %987 = vmatmul.mubr.msk.f32.vlgmr.msra.gmra.mrb[8].mxu0 %vm138_vm3, %v631_v24 }
 0x6fc   :  { %v710_v29 = vpop.f32.mrb[8].mxu0 }
 0x6fd   :  { %v711_v30 = vadd.f32 %v710_v29, %v640_v28  ;;  %v988_v31 = vpop.f32.mrb[9].mxu0 }
 0x6ff   :  { %v714_v32 = vmax.f32 %v711_v30, 0.0 }
 0x701   :  { %v719_v34 = vsel %vm138_vm3, %v714_v32, %v717_v33 }
 0x702   :  { %1022 = vmatmul.mubr.f32.vlgmr.msra.gmra.mrb[6].mxu1 %v719_v34 }
 0x7d5   :  { %v803_v38 = vpop.f32.mrb[6].mxu1 }
 0x7d6   :  { %v804_v39 = vadd.f32 %v803_v38, %v736_v36  ;;  %v1023_v40 = vpop.f32.mrb[7].mxu1 }
 0x7d8   :  { %v810_v41 = vrot.slane %v804_v39, %v809_v37 }
 0x7da   :  { %811 = vst [vmem:[%s1351_s2] sm:$0xff] %v810_v41 }
 0x7db   :  { %816 = vsyncpa [#allocation3], 1 }

</bundles_post_ra>
